<compile_context>
chip_gen: v5e
topology: v5e:2x2
jax: 0.10.0
libtpu: 0.0.40
codegen_flags: <defaults>
</compile_context>

<pallas_src>
import functools

import jax
import jax.numpy as jnp
from jax.experimental import pallas as pl
from jax.experimental.pallas import tpu as pltpu

BN_EPS = 1e-5


def _round_up(v, m):
    return (v + m - 1) // m * m


def _fused_kernel(x_ref, w1_ref, g_ref, beta_ref, w2_ref, b2_ref, o_ref,
                  h_ref, sum_ref, ssq_ref, scale_ref, shift_ref, *, inv_n):
    p = pl.program_id(0)   # phase: 0 = l1 matmul + stats, 1 = BN + ReLU + l2
    i = pl.program_id(1)   # batch tile index

    # ---------------- phase 0: h = x @ w1 (bias-free) + batch stats ----------
    @pl.when(jnp.logical_and(p == 0, i == 0))
    def _init():
        sum_ref[...] = jnp.zeros_like(sum_ref)
        ssq_ref[...] = jnp.zeros_like(ssq_ref)

    @pl.when(p == 0)
    def _phase0():
        # bf16 operands, f32 accumulation on the MXU; x cast in VMEM (not in
        # the wrapper) to avoid an extra HBM round trip of x.
        h = jnp.dot(x_ref[...].astype(jnp.bfloat16), w1_ref[...],
                    preferred_element_type=jnp.float32)
        h_ref[i] = h.astype(h_ref.dtype)          # persistent VMEM, no HBM trip
        # Axis-0 partial sums (XLU/VPU have slack next to the shallow-K matmul;
        # the 'ones @ h' MXU trick is only worth it if a bundle dump shows the
        # VPU/XLU slot binding).
        sum_ref[...] += jnp.sum(h, axis=0, keepdims=True)
        ssq_ref[...] += jnp.sum(h * h, axis=0, keepdims=True)

    # ------------- phase transition: fold BN into one scale/shift ------------
    @pl.when(jnp.logical_and(p == 1, i == 0))
    def _fold_bn():
        mean = sum_ref[...] * inv_n                       # [1, hp]
        var = jnp.maximum(ssq_ref[...] * inv_n - mean * mean, 0.0)  # biased var
        inv_std = jax.lax.rsqrt(var + BN_EPS)             # EUP slot
        scale = inv_std * g_ref[...]
        scale_ref[...] = scale
        shift_ref[...] = beta_ref[...] - mean * scale

    # ---------------- phase 1: normalize + ReLU + l2 matmul ------------------
    @pl.when(p == 1)
    def _phase1():
        h = h_ref[i].astype(jnp.float32)
        y = jnp.maximum(h * scale_ref[...] + shift_ref[...], 0.0)  # single FMA + ReLU
        o_ref[...] = (jnp.dot(y.astype(jnp.bfloat16), w2_ref[...],
                              preferred_element_type=jnp.float32)
                      + b2_ref[...]).astype(o_ref.dtype)


def prediction_mlp(x, w1, b1, gamma, beta, w2, b2, *, block_n=512):
    """PredictionMLP forward (training-mode BN). x: [N, in_dim] f32 -> [N, out_dim] f32."""
    del b1  # exactly absorbed by the batch-mean subtraction of BatchNorm1d
    n, in_dim = x.shape
    hid_dim = w1.shape[1]
    out_dim = w2.shape[1]

    # Lane-dense padding for the activation/output feature dims; in_dim (K of
    # the first matmul) is left at the true full dim (full dims are exempt
    # from the (8,128) block rule). Batch is tiled by tn.
    hp = _round_up(hid_dim, 128)
    op = _round_up(out_dim, 128)
    tn = _round_up(min(block_n, n), 16)
    n_pad = _round_up(n, tn)
    nt = n_pad // tn

    # h scratch: f32 if it fits comfortably in VMEM, else bf16 (stats are
    # still accumulated from the f32 MXU result either way).
    h_dtype = jnp.float32 if nt * tn * hp * 4 <= 24 * 1024 * 1024 else jnp.bfloat16

    def pad2(a, r, c):
        if a.shape == (r, c):
            return a
        return jnp.pad(a, ((0, r - a.shape[0]), (0, c - a.shape[1])))

    x_p = pad2(x, n_pad, in_dim)                       # f32; padded rows -> h rows == 0
    w1_p = pad2(w1, in_dim, hp).astype(jnp.bfloat16)
    w2_p = pad2(w2, hp, op).astype(jnp.bfloat16)
    g_p = pad2(gamma.reshape(1, -1), 1, hp)            # zero padded hid lanes stay 0
    be_p = pad2(beta.reshape(1, -1), 1, hp)
    b2_p = pad2(b2.reshape(1, -1), 1, op)

    # Rough VMEM budget: scratch + double-buffered tiles + resident weights.
    h_bytes = nt * tn * hp * jnp.dtype(h_dtype).itemsize
    est = (h_bytes + 4 * hp * 4                      # h + sum/ssq/scale/shift
           + 2 * tn * in_dim * 4                     # x tiles (f32, 2 buffers)
           + 2 * in_dim * hp * 2 + 2 * hp * op * 2   # w1 / w2 (bf16, 2 buffers)
           + 2 * (2 * hp + op) * 4                   # gamma/beta/b2
           + 2 * tn * op * 4)                        # output tiles
    vmem_limit = int(min(64 * 1024 * 1024, max(32 * 1024 * 1024, est * 3 // 2)))

    out = pl.pallas_call(
        functools.partial(_fused_kernel, inv_n=1.0 / n),
        out_shape=jax.ShapeDtypeStruct((n_pad, op), jnp.float32),
        grid=(2, nt),                                  # (phase, batch tile)
        in_specs=[
            # x: real tile in phase 0; frozen at block 0 during phase 1 so no
            # per-tile re-fetch is issued for the phase that does not use it.
            pl.BlockSpec((tn, in_dim), lambda p, i: ((1 - p) * i, 0)),
            pl.BlockSpec((in_dim, hp), lambda p, i: (0, 0)),   # w1 (VMEM resident)
            pl.BlockSpec((1, hp), lambda p, i: (0, 0)),        # gamma
            pl.BlockSpec((1, hp), lambda p, i: (0, 0)),        # beta
            pl.BlockSpec((hp, op), lambda p, i: (0, 0)),       # w2 (VMEM resident)
            pl.BlockSpec((1, op), lambda p, i: (0, 0)),        # b2
        ],
        # Constant block index during phase 0 -> never flushed (and no garbage
        # write-back) until phase 1 has written it.
        out_specs=pl.BlockSpec((tn, op), lambda p, i: (p * i, 0)),
        scratch_shapes=[
            pltpu.VMEM((nt, tn, hp), h_dtype),     # persistent h (no HBM round trip)
            pltpu.VMEM((1, hp), jnp.float32),      # batch sum
            pltpu.VMEM((1, hp), jnp.float32),      # batch sum of squares
            pltpu.VMEM((1, hp), jnp.float32),      # folded BN scale
            pltpu.VMEM((1, hp), jnp.float32),      # folded BN shift
        ],
        compiler_params=pltpu.CompilerParams(
            # Both axes sequential: stats + h scratch are shared across steps.
            dimension_semantics=("arbitrary", "arbitrary"),
            vmem_limit_bytes=vmem_limit),
    )(x_p, w1_p, g_p, be_p, w2_p, b2_p)

    return out[:n, :out_dim]


def _reference(x, w1, b1, gamma, beta, w2, b2, *, matmul_dtype=jnp.float32):
    h = jnp.dot(x.astype(matmul_dtype), w1.astype(matmul_dtype),
                preferred_element_type=jnp.float32) + b1
    mean = h.mean(axis=0, keepdims=True)
    var = ((h - mean) ** 2).mean(axis=0, keepdims=True)
    h = (h - mean) / jnp.sqrt(var + BN_EPS) * gamma + beta
    h = jnp.maximum(h, 0.0)
    return jnp.dot(h.astype(matmul_dtype), w2.astype(matmul_dtype),
                   preferred_element_type=jnp.float32) + b2


if __name__ == "__main__":
    # Small shapes consistent with PredictionMLP(in_dim=32, hid_dim=64, out_dim=32).
    N, IN_DIM, HID_DIM, OUT_DIM = 32, 32, 64, 32

    key = jax.random.PRNGKey(0)
    kx, kw1, kb1, kw2, kb2, kg, kbeta = jax.random.split(key, 7)

    x = jax.random.normal(kx, (N, IN_DIM), dtype=jnp.float32)

    lim1 = 1.0 / (IN_DIM ** 0.5)
    w1 = jax.random.uniform(kw1, (IN_DIM, HID_DIM), jnp.float32, -lim1, lim1)
    b1 = jax.random.uniform(kb1, (HID_DIM,), jnp.float32, -lim1, lim1)
    lim2 = 1.0 / (HID_DIM ** 0.5)
    w2 = jax.random.uniform(kw2, (HID_DIM, OUT_DIM), jnp.float32, -lim2, lim2)
    b2 = jax.random.uniform(kb2, (OUT_DIM,), jnp.float32, -lim2, lim2)
    gamma = jnp.ones((HID_DIM,), jnp.float32) + 0.01 * jax.random.normal(kg, (HID_DIM,))
    beta = 0.01 * jax.random.normal(kbeta, (HID_DIM,))

    # block_n=16 -> 2 batch tiles: exercises multi-tile stats accumulation and
    # both phases of the fused grid.
    out = prediction_mlp(x, w1, b1, gamma, beta, w2, b2, block_n=16)
    out = jax.block_until_ready(out)
    assert out.shape == (N, OUT_DIM)

    # Matched reference (same bf16 matmul operands): tight tolerance.
    ref_bf16 = _reference(x, w1, b1, gamma, beta, w2, b2,
                          matmul_dtype=jnp.bfloat16)
    err_m = jnp.max(jnp.abs(out - ref_bf16))
    assert jnp.allclose(out, ref_bf16, atol=5e-3, rtol=5e-3), (
        f"bf16-matched max abs err {err_m}")

    # Full-f32 reference (module semantics): bf16-level tolerance.
    ref_f32 = _reference(x, w1, b1, gamma, beta, w2, b2,
                         matmul_dtype=jnp.float32)
    err_f = jnp.max(jnp.abs(out - ref_f32))
    assert jnp.allclose(out, ref_f32, atol=5e-2, rtol=5e-2), (
        f"f32 max abs err {err_f}")

    # Ragged batch (N not a multiple of the tile): zero-row padding path.
    N2 = 24
    x2 = x[:N2]
    out2 = jax.block_until_ready(
        prediction_mlp(x2, w1, b1, gamma, beta, w2, b2, block_n=16))
    ref2 = _reference(x2, w1, b1, gamma, beta, w2, b2, matmul_dtype=jnp.float32)
    err2 = jnp.max(jnp.abs(out2 - ref2))
    assert out2.shape == (N2, OUT_DIM)
    assert jnp.allclose(out2, ref2, atol=5e-2, rtol=5e-2), (
        f"ragged-batch max abs err {err2}")

    print("KERNEL_OK")
</pallas_src>

<mosaic_0001>
module attributes {stable_mosaic.version = 11 : i64} {
  func.func @_fused_kernel(%arg0: i32, %arg1: i32, %arg2: memref<16x32xf32, #tpu.memory_space<vmem>>, %arg3: memref<32x128xbf16, #tpu.memory_space<vmem>>, %arg4: memref<1x128xf32, #tpu.memory_space<vmem>>, %arg5: memref<1x128xf32, #tpu.memory_space<vmem>>, %arg6: memref<128x128xbf16, #tpu.memory_space<vmem>>, %arg7: memref<1x128xf32, #tpu.memory_space<vmem>>, %arg8: memref<16x128xf32, #tpu.memory_space<vmem>>, %arg9: memref<2x16x128xf32, #tpu.memory_space<vmem>>, %arg10: memref<1x128xf32, #tpu.memory_space<vmem>>, %arg11: memref<1x128xf32, #tpu.memory_space<vmem>>, %arg12: memref<1x128xf32, #tpu.memory_space<vmem>>, %arg13: memref<1x128xf32, #tpu.memory_space<vmem>>) attributes {dimension_semantics = [#tpu.dimension_semantics<arbitrary>, #tpu.dimension_semantics<arbitrary>], iteration_bounds = array<i64: 2, 2>, scalar_prefetch = 0 : i64, scratch_operands = 5 : i64, tpu.core_type = #tpu.core_type<tc>, window_params = [{transform_indices = @transform_0, window_bounds = array<i64: 16, 32>}, {pipeline_mode = #tpu.pipeline_mode<synchronous>, transform_indices = @transform_1, window_bounds = array<i64: 32, 128>}, {pipeline_mode = #tpu.pipeline_mode<synchronous>, transform_indices = @transform_2, window_bounds = array<i64: 1, 128>}, {pipeline_mode = #tpu.pipeline_mode<synchronous>, transform_indices = @transform_3, window_bounds = array<i64: 1, 128>}, {pipeline_mode = #tpu.pipeline_mode<synchronous>, transform_indices = @transform_4, window_bounds = array<i64: 128, 128>}, {pipeline_mode = #tpu.pipeline_mode<synchronous>, transform_indices = @transform_5, window_bounds = array<i64: 1, 128>}, {transform_indices = @transform_6, window_bounds = array<i64: 16, 128>}]} {
    %c0_i32 = arith.constant 0 : i32
    %0 = arith.cmpi eq, %arg0, %c0_i32 : i32
    %c0_i32_0 = arith.constant 0 : i32
    %1 = arith.cmpi eq, %arg1, %c0_i32_0 : i32
    %2 = arith.andi %0, %1 : i1
    %3 = arith.extui %2 : i1 to i32
    %c0_i32_1 = arith.constant 0 : i32
    %4 = arith.cmpi ne, %3, %c0_i32_1 : i32
    scf.if %4 {
      %cst = arith.constant 0.000000e+00 : f32
      %16 = vector.broadcast %cst : f32 to vector<1x128xf32>
      %c0 = arith.constant 0 : index
      %c0_8 = arith.constant 0 : index
      %17 = vector.load %arg10[%c0, %c0_8] : memref<1x128xf32, #tpu.memory_space<vmem>>, vector<1x128xf32>
      tpu.vector_store %arg10[%c0, %c0_8], %16 {strides = array<i32>} : memref<1x128xf32, #tpu.memory_space<vmem>>, vector<1x128xf32>,
      %cst_9 = arith.constant 0.000000e+00 : f32
      %18 = vector.broadcast %cst_9 : f32 to vector<1x128xf32>
      %c0_10 = arith.constant 0 : index
      %c0_11 = arith.constant 0 : index
      %19 = vector.load %arg11[%c0_10, %c0_11] : memref<1x128xf32, #tpu.memory_space<vmem>>, vector<1x128xf32>
      tpu.vector_store %arg11[%c0_10, %c0_11], %18 {strides = array<i32>} : memref<1x128xf32, #tpu.memory_space<vmem>>, vector<1x128xf32>,
    } else {
    }
    %c0_i32_2 = arith.constant 0 : i32
    %5 = arith.cmpi eq, %arg0, %c0_i32_2 : i32
    %6 = arith.extui %5 : i1 to i32
    %c0_i32_3 = arith.constant 0 : i32
    %7 = arith.cmpi ne, %6, %c0_i32_3 : i32
    scf.if %7 {
      %c0 = arith.constant 0 : index
      %c0_8 = arith.constant 0 : index
      %16 = vector.load %arg2[%c0, %c0_8] : memref<16x32xf32, #tpu.memory_space<vmem>>, vector<16x32xf32>
      %17 = arith.truncf %16 : vector<16x32xf32> to vector<16x32xbf16>
      %c0_9 = arith.constant 0 : index
      %c0_10 = arith.constant 0 : index
      %18 = vector.load %arg3[%c0_9, %c0_10] : memref<32x128xbf16, #tpu.memory_space<vmem>>, vector<32x128xbf16>
      %cst = arith.constant dense<0.000000e+00> : vector<16x128xf32>
      %19 = tpu.matmul %17, %18, %cst {dimension_numbers = #tpu.dot_dimension_numbers<[1], [0], [0], [1], [0, 0, 1, 1], [], []>} : vector<16x32xbf16>, vector<32x128xbf16>, vector<16x128xf32> -> vector<16x128xf32>
      %20 = arith.index_cast %arg1 : i32 to index
      %c0_11 = arith.constant 0 : index
      %c0_12 = arith.constant 0 : index
      %21 = vector.load %arg9[%20, %c0_11, %c0_12] : memref<2x16x128xf32, #tpu.memory_space<vmem>>, vector<1x16x128xf32>
      %22 = vector.shape_cast %21 : vector<1x16x128xf32> to vector<16x128xf32>
      %23 = vector.shape_cast %19 : vector<16x128xf32> to vector<1x16x128xf32>
      tpu.vector_store %arg9[%20, %c0_11, %c0_12], %23 {strides = array<i32>} : memref<2x16x128xf32, #tpu.memory_space<vmem>>, vector<1x16x128xf32>,
      %c0_13 = arith.constant 0 : index
      %c0_14 = arith.constant 0 : index
      %24 = vector.load %arg10[%c0_13, %c0_14] : memref<1x128xf32, #tpu.memory_space<vmem>>, vector<1x128xf32>
      %cst_15 = arith.constant dense<0.000000e+00> : vector<128xf32>
      %25 = vector.multi_reduction <add>, %19, %cst_15 [0] : vector<16x128xf32> to vector<128xf32>
      %26 = vector.shape_cast %25 : vector<128xf32> to vector<1x128xf32>
      %27 = arith.addf %24, %26 : vector<1x128xf32>
      %c0_16 = arith.constant 0 : index
      %c0_17 = arith.constant 0 : index
      %28 = vector.load %arg10[%c0_16, %c0_17] : memref<1x128xf32, #tpu.memory_space<vmem>>, vector<1x128xf32>
      tpu.vector_store %arg10[%c0_16, %c0_17], %27 {strides = array<i32>} : memref<1x128xf32, #tpu.memory_space<vmem>>, vector<1x128xf32>,
      %c0_18 = arith.constant 0 : index
      %c0_19 = arith.constant 0 : index
      %29 = vector.load %arg11[%c0_18, %c0_19] : memref<1x128xf32, #tpu.memory_space<vmem>>, vector<1x128xf32>
      %30 = arith.mulf %19, %19 : vector<16x128xf32>
      %cst_20 = arith.constant dense<0.000000e+00> : vector<128xf32>
      %31 = vector.multi_reduction <add>, %30, %cst_20 [0] : vector<16x128xf32> to vector<128xf32>
      %32 = vector.shape_cast %31 : vector<128xf32> to vector<1x128xf32>
      %33 = arith.addf %29, %32 : vector<1x128xf32>
      %c0_21 = arith.constant 0 : index
      %c0_22 = arith.constant 0 : index
      %34 = vector.load %arg11[%c0_21, %c0_22] : memref<1x128xf32, #tpu.memory_space<vmem>>, vector<1x128xf32>
      tpu.vector_store %arg11[%c0_21, %c0_22], %33 {strides = array<i32>} : memref<1x128xf32, #tpu.memory_space<vmem>>, vector<1x128xf32>,
    } else {
    }
    %c1_i32 = arith.constant 1 : i32
    %8 = arith.cmpi eq, %arg0, %c1_i32 : i32
    %c0_i32_4 = arith.constant 0 : i32
    %9 = arith.cmpi eq, %arg1, %c0_i32_4 : i32
    %10 = arith.andi %8, %9 : i1
    %11 = arith.extui %10 : i1 to i32
    %c0_i32_5 = arith.constant 0 : i32
    %12 = arith.cmpi ne, %11, %c0_i32_5 : i32
    scf.if %12 {
      %c0 = arith.constant 0 : index
      %c0_8 = arith.constant 0 : index
      %16 = vector.load %arg10[%c0, %c0_8] : memref<1x128xf32, #tpu.memory_space<vmem>>, vector<1x128xf32>
      %cst = arith.constant 3.125000e-02 : f32
      %17 = vector.broadcast %cst : f32 to vector<1x128xf32>
      %18 = arith.mulf %16, %17 : vector<1x128xf32>
      %c0_9 = arith.constant 0 : index
      %c0_10 = arith.constant 0 : index
      %19 = vector.load %arg11[%c0_9, %c0_10] : memref<1x128xf32, #tpu.memory_space<vmem>>, vector<1x128xf32>
      %cst_11 = arith.constant 3.125000e-02 : f32
      %20 = vector.broadcast %cst_11 : f32 to vector<1x128xf32>
      %21 = arith.mulf %19, %20 : vector<1x128xf32>
      %22 = arith.mulf %18, %18 : vector<1x128xf32>
      %23 = arith.subf %21, %22 : vector<1x128xf32>
      %cst_12 = arith.constant 0.000000e+00 : f32
      %24 = vector.broadcast %cst_12 : f32 to vector<1x128xf32>
      %25 = arith.maximumf %23, %24 : vector<1x128xf32>
      %cst_13 = arith.constant 9.99999974E-6 : f32
      %26 = vector.broadcast %cst_13 : f32 to vector<1x128xf32>
      %27 = arith.addf %25, %26 : vector<1x128xf32>
      %28 = math.rsqrt %27 : vector<1x128xf32>
      %c0_14 = arith.constant 0 : index
      %c0_15 = arith.constant 0 : index
      %29 = vector.load %arg4[%c0_14, %c0_15] : memref<1x128xf32, #tpu.memory_space<vmem>>, vector<1x128xf32>
      %30 = arith.mulf %28, %29 : vector<1x128xf32>
      %c0_16 = arith.constant 0 : index
      %c0_17 = arith.constant 0 : index
      %31 = vector.load %arg12[%c0_16, %c0_17] : memref<1x128xf32, #tpu.memory_space<vmem>>, vector<1x128xf32>
      tpu.vector_store %arg12[%c0_16, %c0_17], %30 {strides = array<i32>} : memref<1x128xf32, #tpu.memory_space<vmem>>, vector<1x128xf32>,
      %c0_18 = arith.constant 0 : index
      %c0_19 = arith.constant 0 : index
      %32 = vector.load %arg5[%c0_18, %c0_19] : memref<1x128xf32, #tpu.memory_space<vmem>>, vector<1x128xf32>
      %33 = arith.mulf %18, %30 : vector<1x128xf32>
      %34 = arith.subf %32, %33 : vector<1x128xf32>
      %c0_20 = arith.constant 0 : index
      %c0_21 = arith.constant 0 : index
      %35 = vector.load %arg13[%c0_20, %c0_21] : memref<1x128xf32, #tpu.memory_space<vmem>>, vector<1x128xf32>
      tpu.vector_store %arg13[%c0_20, %c0_21], %34 {strides = array<i32>} : memref<1x128xf32, #tpu.memory_space<vmem>>, vector<1x128xf32>,
    } else {
    }
    %c1_i32_6 = arith.constant 1 : i32
    %13 = arith.cmpi eq, %arg0, %c1_i32_6 : i32
    %14 = arith.extui %13 : i1 to i32
    %c0_i32_7 = arith.constant 0 : i32
    %15 = arith.cmpi ne, %14, %c0_i32_7 : i32
    scf.if %15 {
      %16 = arith.index_cast %arg1 : i32 to index
      %c0 = arith.constant 0 : index
      %c0_8 = arith.constant 0 : index
      %17 = vector.load %arg9[%16, %c0, %c0_8] : memref<2x16x128xf32, #tpu.memory_space<vmem>>, vector<1x16x128xf32>
      %18 = vector.shape_cast %17 : vector<1x16x128xf32> to vector<16x128xf32>
      %c0_9 = arith.constant 0 : index
      %c0_10 = arith.constant 0 : index
      %19 = vector.load %arg12[%c0_9, %c0_10] : memref<1x128xf32, #tpu.memory_space<vmem>>, vector<1x128xf32>
      %20 = vector.broadcast %19 : vector<1x128xf32> to vector<16x128xf32>
      %21 = arith.mulf %18, %20 : vector<16x128xf32>
      %c0_11 = arith.constant 0 : index
      %c0_12 = arith.constant 0 : index
      %22 = vector.load %arg13[%c0_11, %c0_12] : memref<1x128xf32, #tpu.memory_space<vmem>>, vector<1x128xf32>
      %23 = vector.broadcast %22 : vector<1x128xf32> to vector<16x128xf32>
      %24 = arith.addf %21, %23 : vector<16x128xf32>
      %cst = arith.constant 0.000000e+00 : f32
      %25 = vector.broadcast %cst : f32 to vector<16x128xf32>
      %26 = arith.maximumf %24, %25 : vector<16x128xf32>
      %27 = arith.truncf %26 : vector<16x128xf32> to vector<16x128xbf16>
      %c0_13 = arith.constant 0 : index
      %c0_14 = arith.constant 0 : index
      %28 = vector.load %arg6[%c0_13, %c0_14] : memref<128x128xbf16, #tpu.memory_space<vmem>>, vector<128x128xbf16>
      %cst_15 = arith.constant dense<0.000000e+00> : vector<16x128xf32>
      %29 = tpu.matmul %27, %28, %cst_15 {dimension_numbers = #tpu.dot_dimension_numbers<[1], [0], [0], [1], [0, 0, 1, 1], [], []>} : vector<16x128xbf16>, vector<128x128xbf16>, vector<16x128xf32> -> vector<16x128xf32>
      %c0_16 = arith.constant 0 : index
      %c0_17 = arith.constant 0 : index
      %30 = vector.load %arg7[%c0_16, %c0_17] : memref<1x128xf32, #tpu.memory_space<vmem>>, vector<1x128xf32>
      %31 = vector.broadcast %30 : vector<1x128xf32> to vector<16x128xf32>
      %32 = arith.addf %29, %31 : vector<16x128xf32>
      %c0_18 = arith.constant 0 : index
      %c0_19 = arith.constant 0 : index
      %33 = vector.load %arg8[%c0_18, %c0_19] : memref<16x128xf32, #tpu.memory_space<vmem>>, vector<16x128xf32>
      tpu.vector_store %arg8[%c0_18, %c0_19], %32 {strides = array<i32>} : memref<16x128xf32, #tpu.memory_space<vmem>>, vector<16x128xf32>,
    } else {
    }
    return
  }
  func.func @transform_0(%arg0: i32, %arg1: i32) -> (i32, i32) {
    %c1_i32 = arith.constant 1 : i32
    %0 = arith.subi %c1_i32, %arg0 : i32
    %1 = arith.muli %0, %arg1 : i32
    %c0_i32 = arith.constant 0 : i32
    %c0_i32_0 = arith.constant 0 : i32
    return %1, %c0_i32 : i32, i32
  }
  func.func @transform_1(%arg0: i32, %arg1: i32) -> (i32, i32) {
    %c0_i32 = arith.constant 0 : i32
    %c0_i32_0 = arith.constant 0 : i32
    %c0_i32_1 = arith.constant 0 : i32
    return %c0_i32, %c0_i32_0 : i32, i32
  }
  func.func @transform_2(%arg0: i32, %arg1: i32) -> (i32, i32) {
    %c0_i32 = arith.constant 0 : i32
    %c0_i32_0 = arith.constant 0 : i32
    %c0_i32_1 = arith.constant 0 : i32
    return %c0_i32, %c0_i32_0 : i32, i32
  }
  func.func @transform_3(%arg0: i32, %arg1: i32) -> (i32, i32) {
    %c0_i32 = arith.constant 0 : i32
    %c0_i32_0 = arith.constant 0 : i32
    %c0_i32_1 = arith.constant 0 : i32
    return %c0_i32, %c0_i32_0 : i32, i32
  }
  func.func @transform_4(%arg0: i32, %arg1: i32) -> (i32, i32) {
    %c0_i32 = arith.constant 0 : i32
    %c0_i32_0 = arith.constant 0 : i32
    %c0_i32_1 = arith.constant 0 : i32
    return %c0_i32, %c0_i32_0 : i32, i32
  }
  func.func @transform_5(%arg0: i32, %arg1: i32) -> (i32, i32) {
    %c0_i32 = arith.constant 0 : i32
    %c0_i32_0 = arith.constant 0 : i32
    %c0_i32_1 = arith.constant 0 : i32
    return %c0_i32, %c0_i32_0 : i32, i32
  }
  func.func @transform_6(%arg0: i32, %arg1: i32) -> (i32, i32) {
    %0 = arith.muli %arg0, %arg1 : i32
    %c0_i32 = arith.constant 0 : i32
    %c0_i32_0 = arith.constant 0 : i32
    return %0, %c0_i32 : i32, i32
  }
}

</mosaic_0001>

<bundles_post_ra>
// kernel: tpu_custom_call.1
= control target key start
LH: loop header
LB: loop body
LE: loop exit
PB: predicated region body
PF: predicated region fallthrough
CT: control target
= control target key end

     0   :  { %s1364_s0 = inlined_call_operand.hbm [shape: f32[32,32], index: 0, kind: input, shape index: {}]   ;;  %s1365_s1 = inlined_call_operand.hbm [shape: bf16[32,128], index: 1, kind: input, shape index: {}]   ;;  %s1366_s2 = inlined_call_operand.vmem [shape: f32[1,128], index: 2, kind: input, shape index: {}]   ;;  %s1367_s3 = inlined_call_operand.vmem [shape: f32[1,128], index: 3, kind: input, shape index: {}]   ;;  %s1368_s4 = inlined_call_operand.hbm [shape: bf16[128,128], index: 4, kind: input, shape index: {}]   ;;  %s1369_s5 = inlined_call_operand.vmem [shape: f32[1,128], index: 5, kind: input, shape index: {}]   ;;  %s1370_s6 = inlined_call_operand.hbm [shape: f32[32,128], index: 6, kind: output, shape index: {}]  }
   0x1   :  { %1380 = sst [smem:[#allocation24_spill]] %s1365_s1 }
   0x2   :  { %1381 = sst [smem:[#allocation25_spill]] %s1366_s2 }
   0x3   :  { %1382 = sst [smem:[#allocation26_spill]] %s1367_s3 }
   0x4   :  { %1383 = sst [smem:[#allocation27_spill]] %s1368_s4 }
   0x5   :  { %1384 = sst [smem:[#allocation28_spill]] %s1369_s5 }
   0x6   :  { %1385 = sst [smem:[#allocation29_spill]] %s1370_s6 }
   0x7   :  { %11 = vsyncpa [#allocation8], 0 }
   0x8   :  { %13 = vsyncpa [#allocation8 + $0x1], 0 }
   0x9   :  { %14 = vsyncpa [#allocation11], 0 }
   0xa   :  { %15 = vsyncpa [#allocation9], 0 }
   0xb   :  { %17 = vsyncpa [#allocation9 + $0x1], 0  ;;  %s1138_s21 = smov 0   ;;  %s1140_s22 = smov 0  }
   0xc   :  { %s1142_s23 = smov 0   ;;  %s1144_s24 = smov 0  }
   0xd   :  { %s1146_s25 = smov 0   ;;  %s1148_s26 = smov 0  }
   0xe   :  { %s1150_s27 = smov 0   ;;  %s1152_s28 = smov 0  }
   0xf   :  { %s1154_s29 = smov 0   ;;  %s1156_s30 = smov 0  }
  0x10   :  { %s1158_s7 = smov 0  }
  0x11 LB: > { %1386 = sst [smem:[#allocation17_spill]] %s1052_s21  ;;  %s665_s8 = sadd.s32 4294967295, %s1092_s7   ;;  %s1092_s7 = sphi %s1158_s7, %s23_s7   ;;  %s1088_s30 = sphi %s1156_s30, %s1415_s30   ;;  %s1084_s29 = sphi %s1154_s29, %s1422_s29   ;;  %s1080_s28 = sphi %s1152_s28, %s1414_s28   ;;  %s1076_s27 = sphi %s1150_s27, %s1413_s27   ;;  %s1072_s26 = sphi %s1148_s26, %s1421_s26   ;;  %s1068_s25 = sphi %s1146_s25, %s1420_s25   ;;  %s1064_s24 = sphi %s1144_s24, %s1419_s24   ;;  %s1060_s23 = sphi %s1142_s23, %s1418_s23   ;;  %s1056_s22 = sphi %s1140_s22, %s1417_s22   ;;  %s1052_s21 = sphi %s1138_s21, %s1416_s21  }
  0x12   : > { %1387 = sst [smem:[#allocation18_spill]] %s1076_s27  ;;  %s666_s9 = sadd.s32 4294967294, %s1092_s7  }
  0x13   : > { %1388 = sst [smem:[#allocation19_spill]] %s1084_s29  ;;  %p59_p0 = scmp.ne.s32.totalorder %s1068_s25, %s1064_s24 }
  0x14   : > { %1389 = sst [smem:[#allocation20_spill]] %s1088_s30  ;;  %p1194_p1 = scmp.eq.s32.totalorder %s665_s8, 0 }
  0x15   : > { %p189_p2 = scmp.ne.s32.totalorder %s1060_s23, %s1056_s22  ;;  %p190_p3 = scmp.eq.s32.totalorder %s665_s8, 3 }
  0x16   : > { %p1202_p4 = por %p1194_p1, %p59_p0  ;;  %p195_p5 = scmp.ne.s32.totalorder %s1056_s22, %s1052_s21 }
  0x17   : > { %p1208_p6 = por %p190_p3, %p189_p2  ;;  %p196_p7 = scmp.eq.s32.totalorder %s666_s9, 3 }
  0x18   : > { %p667_p8 = scmp.ge.s32.totalorder %s1092_s7, 1  ;;  %p203_p9 = scmp.lt.s32.totalorder %s1092_s7, 5 }
  0x19   : > { %s1392_s12 = scalar_select %p1208_p6, 1, 0 }
  0x1a   : > { %p1214_p10 = por %p196_p7, %p195_p5  ;;  %p1218_p11 = pnand %p667_p8, %p203_p9 }
  0x1b   : > { %1393 = sst [smem:[#allocation21_spill]] %s1392_s12  ;;  %s1094_s18 = smov [#allocation10]  }
  0x1c   : > { %s1394_s13 = scalar_select %p1214_p10, 1, 0 }
  0x1d   : > { %s1397_s1 = sld [smem:[#allocation24_spill]]  ;;  %p753_p12 = pneg %p1218_p11 }
  0x1e   : > { %1395 = sst [smem:[#allocation22_spill]] %s1394_s13  ;;  %s216_s19 = sshll.u32 %s1094_s18, 4  ;;  %s217_s19 = int_to_ptr.vmem [resolvable:$true] %s216_s19 }
  0x1f   : > { %p754_p13 = pnand %p753_p12, %p1194_p1  ;;  %s1398_s4 = sld [smem:[#allocation27_spill]] }
  0x20   : > { %s1095_s9 = smov 64   ;;  %s1096_s15 = smov 4  }
  0x21   : > { %s1097_s16 = smov [#allocation12]   ;;  %s35_s20 = sadd.s32 1, %s1088_s30 }
  0x22   : > { %s236_s18 = sshll.u32 %s1097_s16, 4  ;;  %s39_s24 = ssub.s32 1, %s1088_s30  ;;  %s237_s18 = int_to_ptr.vmem [resolvable:$true] %s236_s18 }
  0x23   : > { %s214_s17 = sshll.u32 %s1397_s1, 4  ;;  %s32_s1 = sadd.s32 1, %s1084_s29  ;;  %s215_s17 = int_to_ptr.hbm [resolvable:$true] %s214_s17 }
  0x24   : > { %756 = dma.hbm_to_vmem [thread:$0]  (!%p754_p13), %s215_s17, 256, %s217_s19, [#allocation11], %s1095_s9, %s1095_s9, %s1096_s15  }
  0x25   : > { %s234_s8 = sshll.u32 %s1398_s4, 4  ;;  %p33_p0 = scmp.ge.s32.totalorder %s32_s1, 2  ;;  %s235_s8 = int_to_ptr.hbm [resolvable:$true] %s234_s8 }
  0x26   : > { %759 = dma.hbm_to_vmem [thread:$0]  (!%p754_p13), %s235_s8, 1024, %s237_s18, [#allocation11], %s1095_s9, %s1095_s9, %s1096_s15  }
  0x27   : > { %s46_s4 = sadd.s32 1, %s1072_s26  ;;  %s1424_s1 = smov (%p33_p0, %s32_s1), 0 }
  0x28   : > { %s1426_s20 = smov (!%p33_p0, %s35_s20), %s1088_s30  ;;  %s40_s17 = smul.u32 %s1084_s29, %s39_s24 }
  0x29   : > { %p53_p2 = scmp.ne.s32.totalorder %s1072_s26, %s1068_s25  ;;  %p37_p3 = scmp.ge.s32.totalorder %s1426_s20, 2 }
  0x2a   : > { %p54_p5 = scmp.eq.s32.totalorder %s1092_s7, 0  ;;  %s174_s19 = smul.u32 %s1084_s29, %s1088_s30 }
  0x2b   : > { %s179_s8 = sadd.s32 1, %s1060_s23  ;;  %s1428_s20 = smov (%p37_p3, %s1426_s20), 0 }
  0x2c   : > { %1399 = sst [smem:[#allocation23_spill]] %s1428_s20  ;;  %p1248_p7 = por %p54_p5, %p53_p2 }
  0x2d   : > { %p770_p8 = scmp.lt.s32.totalorder %s1092_s7, 4  ;;  %s41_s15 = ssub.s32 1, %s1428_s20 }
  0x2e   : > { %s175_s16 = smul.u32 %s1428_s20, %s1424_s1  ;;  %s253_s24 = sand.u32 1, %s1072_s26  }
  0x2f   : > { %s42_s18 = smul.u32 %s41_s15, %s1424_s1  ;;  %s671_s30 = sshll.u32 %s253_s24, 4 }
  0x30   : > { %s176_s13 = ssub.s32 %s174_s19, %s175_s16  ;;  %s729_s12 = sshll.u32 %s40_s17, 4 }
  0x31   : > { %s43_s21 = ssub.s32 %s40_s17, %s42_s18  ;;  %p177_p9 = scmp.eq.s32.totalorder %s176_s13, 0 }
  0x32   : > { %p44_p12 = scmp.eq.s32.totalorder %s43_s21, 0  ;;  %s264_s2 = scalar_lea.hbm %s1364_s0, %s729_s12 }
  0x33   : > { %s1259_s29 = scalar_select %p177_p9, %s1060_s23, %s179_s8  }
  0x34   : > { %s1262_s6 = scalar_select %p44_p12, %s1072_s26, %s46_s4  }
  0x35   : > { %s257_s27 = scalar_lea.vmem [#allocation7], %s671_s30  ;;  %s265_s15 = sshll.u32 %s264_s2, 4  ;;  %s266_s15 = int_to_ptr.hbm [resolvable:$true] %s265_s15 }
  0x36   : > { %s267_s20 = sshll.u32 %s257_s27, 4  ;;  %p761_p13 = pnand %p770_p8, %p1248_p7  ;;  %s268_s20 = int_to_ptr.vmem [resolvable:$true] %s267_s20 }
  0x37   : > { %s254_s13 = scalar_lea.sflag [#allocation8], %s253_s24  ;;  %s1098_s21 = smov 128  }
  0x38   : > { %s1099_s19 = smov 8   ;;  %279 = sbr.rel (%p1218_p11) target bundleno = 495 (0x1ef), region = 44 }
  0x39   : > { %763 = dma.hbm_to_vmem [thread:$0]  (!%p761_p13), %s266_s15, 256, %s268_s20, %s254_s13, %s1098_s21, %s1098_s21, %s1099_s19  }
  0x3a   : > { %s281_s4 = sand.u32 (!%p1218_p11), 1, %s1068_s25  }
  0x3b   : > { %s675_s3 = sshll.u32 (!%p1218_p11), %s281_s4, 4  ;;  %s282_s5 = scalar_lea.sflag (!%p1218_p11), [#allocation8], %s281_s4 }
  0x3c   : > { %s285_s30 = scalar_lea.vmem (!%p1218_p11), [#allocation7], %s675_s3 }
  0x3d   : > { %1039 = dma.done.wait (%p1202_p4), %s282_s5, 256  }
  0x3e   : > { %1041 = vsyncadd (%p1202_p4), %s282_s5, 4294967040 }
  0x3f   : > { %1043 = dma.done.wait (%p1194_p1), [#allocation11], 1280  }
  0x40   : > { %1045 = vsyncadd (%p1194_p1), [#allocation11], 4294966016  ;;  %s1401_s2 = sld [smem:[#allocation18_spill]]  ;;  %s322_s27 = sand.u32 1, %s1056_s22  }
  0x41   : > { %p331_p11 = scmp.eq.s32.totalorder %s1080_s28, 0  ;;  %s678_s12 = sshll.u32 %s322_s27, 4 }
  0x42   : > { %s1289_s11 = scalar_lea.vmem [#allocation13], %s678_s12 }
  0x46   : > { %p332_p0 = scmp.eq.s32.totalorder %s1401_s2, 0 }
  0x48   : > { %p333_p2 = pnand %p332_p0, %p331_p11 }
  0x4a   : > { %336 = sbr.rel (%p333_p2) target bundleno = 82 (0x52), region = 60 }
  0x4f   : > { %v1100_v0 = vmov 0.0  }
  0x50   : > { %337 = vst [vmem:[#allocation3] sm:$0x1] %v1100_v0 }
  0x51   : > { %338 = vst [vmem:[#allocation4] sm:$0x1] %v1100_v0 }
  0x52 PF: > { %p679_p1 = scmp.ne.s32.totalorder %s1080_s28, 0 }
  0x53   : > { %s1402_s10 = sld [smem:[#allocation18_spill]] (!%p679_p1) }
  0x54   : > { %341 = sbr.rel (%p679_p1) target bundleno = 250 (0xfa), region = 64 }
  0x59   : > { %v731_v1 = vld [vmem:[#allocation10 + $0x8] sm:$0xff]  ;;  %v730_v2 = vld [vmem:[#allocation10] sm:$0xff]  ;;  %vm361_vm0 = vcmask 261120   ;;  %s689_s14 = sshll.u32 %s1402_s10, 4  ;;  %v383_v21 = vld [vmem:[#allocation3] sm:$0x1] }
  0x5a   : > { %371 = vmatpush.bf16.msra.mxu0 %v731_v1  ;;  %v342_v3 = vld [vmem:[%s285_s30] sm:$0xff]  ;;  %v343_v4 = vld [vmem:[%s285_s30 + $0x8] sm:$0xff]  ;;  %s380_s20 = scalar_lea.vmem [#allocation2], %s689_s14 }
  0x5b   : > { %v344_v5 = vpack.c.bf16 %v343_v4, %v342_v3  ;;  %v393_v24 = vld [vmem:[#allocation4] sm:$0x1] }
  0x5e   : > { %372 = vmatpush.bf16.msra.mxu0 %v730_v2 }
  0x61   : > { %688 = vmatmul.msk.bf16.vlgmr.msra.gmra.mxu0 %vm361_vm0, %v344_v5 }
  0xde   : > { %v374_v6 = vpop.f32.mrf.mxu0 }
  0xdf   : > { %381 = vst [vmem:[%s380_s20] sm:$0xff] %v374_v6  ;;  %v394_v8 = vmul.f32 %v374_v6, %v374_v6 }
  0xe6   : > { %v376_v7 = vpop.f32.mrf.mxu0 }
  0xe7   : > { %382 = vst [vmem:[%s380_s20 + $0x8] sm:$0xff] %v376_v7  ;;  %v384_v9 = vadd.f32 %v376_v7, %v374_v6  ;;  %v395_v10 = vmul.f32 %v376_v7, %v376_v7 }
  0xe9   : > { %v385_v11 = vrot.slane %v384_v9, 4  ;;  %v396_v12 = vadd.f32 %v395_v10, %v394_v8 }
  0xeb   : > { %v386_v13 = vadd.f32 %v385_v11, %v384_v9  ;;  %v397_v14 = vrot.slane %v396_v12, 4 }
  0xed   : > { %v387_v15 = vrot.slane %v386_v13, 2  ;;  %v398_v16 = vadd.f32 %v397_v14, %v396_v12 }
  0xef   : > { %v388_v17 = vadd.f32 %v387_v15, %v386_v13  ;;  %v399_v18 = vrot.slane %v398_v16, 2 }
  0xf1   : > { %v389_v19 = vrot.slane %v388_v17, 1  ;;  %v400_v20 = vadd.f32 %v399_v18, %v398_v16 }
  0xf3   : > { %v390_v22 = vadd.f32 %v389_v19, %v388_v17  ;;  %v401_v23 = vrot.slane %v400_v20, 1 }
  0xf5   : > { %v391_v25 = vadd.f32 %v390_v22, %v383_v21  ;;  %v402_v26 = vadd.f32 %v401_v23, %v400_v20 }
  0xf7   : > { %392 = vst [vmem:[#allocation3] sm:$0x1] %v391_v25  ;;  %v403_v27 = vadd.f32 %v402_v26, %v393_v24 }
  0xf9   : > { %404 = vst [vmem:[#allocation4] sm:$0x1] %v403_v27 }
  0xfa PF: > { %p405_p4 = scmp.eq.s32.totalorder %s1080_s28, 1 }
  0xfc   : > { %p406_p3 = pnand %p405_p4, %p332_p0 }
  0xfd   : > { %s1404_s16 = sld [smem:[#allocation25_spill]] (!%p406_p3) }
  0xfe   : > { %409 = sbr.rel (%p406_p3) target bundleno = 295 (0x127), region = 68  ;;  %s1405_s15 = sld [smem:[#allocation26_spill]] (!%p406_p3) }
 0x103   : > { %v410_v28 = vld [vmem:[#allocation3] sm:$0x1]  ;;  %v412_v29 = vld [vmem:[#allocation4] sm:$0x1] }
 0x104   : > { %v411_v30 = vmul.f32 0.03125, %v410_v28  ;;  %v413_v31 = vmul.f32 0.03125, %v412_v29  ;;  %v428_v42 = vld [vmem:[%s1404_s16] sm:$0x1] }
 0x105   : > { %v431_v45 = vld [vmem:[%s1405_s15] sm:$0x1] }
 0x106   : > { %v414_v32 = vmul.f32 %v411_v30, %v411_v30 }
 0x108   : > { %v415_v33 = vsub.f32 %v413_v31, %v414_v32 }
 0x10a   : > { %v416_v34 = vmax.f32 %v415_v33, 0.0 }
 0x10c   : > { %v417_v35 = vadd.f32 1e-05, %v416_v34 }
 0x10e   : > { %871 = vrsqrt.f32 %v417_v35  ;;  %vm424_vm1 = vweird.f32 %v417_v35 }
 0x114   : > { %v872_v36 = vpop.eup %871 }
 0x115   : > { %v419_v37 = vmul.f32 %v872_v36, %v417_v35  ;;  %vm425_vm2 = vweird.f32 %v872_v36 }
 0x116   : > { %vm426_vm3 = vmor %vm424_vm1, %vm425_vm2 }
 0x117   : > { %v420_v38 = vmul.f32 %v872_v36, %v419_v37 }
 0x119   : > { %v421_v39 = vmul.f32 0.5, %v420_v38 }
 0x11b   : > { %v422_v40 = vsub.f32 1.5, %v421_v39 }
 0x11d   : > { %v423_v41 = vmul.f32 %v872_v36, %v422_v40 }
 0x11f   : > { %v427_v43 = vsel %vm426_vm3, %v872_v36, %v423_v41 }
 0x120   : > { %v429_v44 = vmul.f32 %v428_v42, %v427_v43 }
 0x122   : > { %430 = vst [vmem:[#allocation5] sm:$0x1] %v429_v44  ;;  %v432_v46 = vmul.f32 %v429_v44, %v411_v30 }
 0x124   : > { %v433_v47 = vsub.f32 %v431_v45, %v432_v46 }
 0x126   : > { %434 = vst [vmem:[#allocation6] sm:$0x1] %v433_v47 }
 0x127 PF: > { %p690_p5 = scmp.ne.s32.totalorder %s1080_s28, 1 }
 0x128   : > { %s1406_s13 = sld [smem:[#allocation18_spill]] (!%p690_p5) }
 0x129   : > { %437 = sbr.rel (%p690_p5) target bundleno = 471 (0x1d7), region = 72  ;;  %s1407_s5 = sld [smem:[#allocation28_spill]] (!%p690_p5) }
 0x12e   : > { %v739_v48 = vld [vmem:[#allocation12 + $0x38] sm:$0xff]  ;;  %v738_v49 = vld [vmem:[#allocation12 + $0x30] sm:$0xff]  ;;  %v737_v50 = vld [vmem:[#allocation12 + $0x28] sm:$0xff]  ;;  %s691_s21 = sshll.u32 %s1406_s13, 4 }
 0x12f   : > { %525 = vmatpush.bf16.msra.mxu0 %v739_v48  ;;  %v736_v51 = vld [vmem:[#allocation12 + $0x20] sm:$0xff]  ;;  %v873_v52 = vld [vmem:[#allocation5] ss:$0 sm:$0xff]  ;;  %v735_v53 = vld [vmem:[#allocation12 + $0x18] sm:$0xff]  ;;  %s439_s19 = scalar_lea.vmem [#allocation2], %s691_s21 }
 0x130   : > { %v440_v54 = vld [vmem:[%s439_s19] sm:$0xff]  ;;  %v441_v55 = vld [vmem:[%s439_s19 + $0x8] sm:$0xff]  ;;  %v732_v1 = vld [vmem:[#allocation12] sm:$0xff] }
 0x131   : > { %v446_v56 = vmul.f32 %v873_v52, %v440_v54  ;;  %v447_v57 = vmul.f32 %v873_v52, %v441_v55  ;;  %v874_v58 = vld [vmem:[#allocation6] ss:$0 sm:$0xff]  ;;  %v734_v59 = vld [vmem:[#allocation12 + $0x10] sm:$0xff]  ;;  %v875_v3 = vld [vmem:[%s1407_s5] ss:$0 sm:$0xff] }
 0x132   : > { %v733_v62 = vld [vmem:[#allocation12 + $0x8] sm:$0xff] }
 0x133   : > { %526 = vmatpush.bf16.msra.mxu0 %v738_v49  ;;  %v452_v60 = vadd.f32 %v874_v58, %v446_v56  ;;  %v453_v61 = vadd.f32 %v874_v58, %v447_v57 }
 0x135   : > { %v454_v63 = vmax.f32 %v452_v60, 0.0  ;;  %v455_v0 = vmax.f32 %v453_v61, 0.0 }
 0x137   : > { %527 = vmatpush.bf16.msra.mxu0 %v737_v50  ;;  %v456_v2 = vpack.c.bf16 %v455_v0, %v454_v63 }
 0x13b   : > { %528 = vmatpush.bf16.msra.mxu0 %v736_v51 }
 0x13f   : > { %529 = vmatpush.bf16.msra.mxu0 %v735_v53 }
 0x143   : > { %530 = vmatpush.bf16.msra.mxu0 %v734_v59 }
 0x147   : > { %531 = vmatpush.bf16.msra.mxu0 %v733_v62 }
 0x14b   : > { %532 = vmatpush.bf16.msra.mxu0 %v732_v1 }
 0x14e   : > { %533 = vmatmul.bf16.vlgmr.msra.gmra.mxu0 %v456_v2 }
 0x1cb   : > { %v534_v4 = vpop.f32.mrf.mxu0 }
 0x1cc   : > { %v535_v5 = vadd.f32 %v875_v3, %v534_v4 }
 0x1ce   : > { %539 = vst [vmem:[%s1289_s11] sm:$0xff] %v535_v5 }
 0x1d3   : > { %v536_v6 = vpop.f32.mrf.mxu0 }
 0x1d4   : > { %v537_v7 = vadd.f32 %v875_v3, %v536_v6 }
 0x1d6   : > { %540 = vst [vmem:[%s1289_s11 + $0x8] sm:$0xff] %v537_v7 }
 0x1d7 PF: > { %s1408_s30 = sld [smem:[#allocation18_spill]]  ;;  %s555_s10 = sshll.u32 %s1289_s11, 4  ;;  %s556_s10 = int_to_ptr.vmem [resolvable:$true] %s555_s10 }
 0x1d8   : > { %s1410_s8 = sld [smem:[#allocation29_spill]]  ;;  %s542_s18 = scalar_lea.sflag [#allocation9], %s322_s27 }
 0x1dd   : > { %s549_s12 = smul.u32 %s1408_s30, %s1080_s28 }
 0x1de   : > { %s986_s11 = scalar_lea.hbm %s1410_s8, 32 }
 0x1df   : > { %s740_s14 = sshll.u32 %s549_s12, 4 }
 0x1e0   : > { %s554_s9 = scalar_lea.hbm %s1410_s8, %s740_s14 }
 0x1e1   : > { %s557_s16 = sshll.u32 %s554_s9, 4  ;;  %s558_s16 = int_to_ptr.hbm [resolvable:$true] %s557_s16 }
 0x1e2   : > { %s980_s24 = sshra.s32 %s558_s16, 4  ;;  %s981_s24 = int_to_ptr.hbm [resolvable:$true] %s980_s24 }
 0x1e3   : > { %s982_s15 = scalar_lea.hbm %s981_s24, 16  ;;  %p987_p12 = scmp.lt.s32.totalorder %s981_s24, %s1410_s8 }
 0x1e4   : > { %p983_p7 = scmp.ne.s32.totalorder %s981_s24, %s982_s15  ;;  %p988_p13 = scmp.lt.s32.totalorder %s986_s11, %s982_s15 }
 0x1e6   : > { %p984_p8 = pnand %p983_p7, %p1208_p6  ;;  %p989_p11 = por %p988_p13, %p987_p12 }
 0x1e8   : > { %p985_p9 = pneg %p984_p8 }
 0x1ea   : > { %p990_p0 = pnand %p989_p11, %p985_p9 }
 0x1ec   : > { %993 = shalt.err (!%p990_p0)
}
 0x1ed   : > { %s1101_s27 = smov 128   ;;  %s1102_s4 = smov 8  }
 0x1ee   : > { %751 = dma.vmem_to_hbm [thread:$0]  (%p1208_p6), %s556_s10, 256, %s558_s16, %s542_s18, %s1101_s27, %s1101_s27, %s1102_s4  }
 0x1ef PF: > { %s1411_s3 = sld [smem:[#allocation17_spill]]  ;;  %p773_p2 = scmp.ge.s32.totalorder %s1092_s7, 2 }
 0x1f1   : > { %p765_p1 = pnand %p773_p2, %p1214_p10 }
 0x1f3   : > { %p766_p4 = pneg %p765_p1 }
 0x1f5   : > { %s572_s30 = sand.u32 1, %s1411_s3  }
 0x1f6   : > { %s573_s12 = scalar_lea.sflag [#allocation9], %s572_s30 }
 0x1f7   : > { %1047 = dma.done.wait (%p766_p4), %s573_s12, 256  }
 0x1f8   : > { %1049 = vsyncadd (%p766_p4), %s573_s12, 4294967040  ;;  %s23_s7 = sadd.s32 1, %s1092_s7   ;;  %s1413_s27 = sld [smem:[#allocation19_spill]] }
 0x1f9   : > { %p20_p3 = scmp.ge.s32.totalorder %s23_s7, 6   ;;  %s1414_s28 = sld [smem:[#allocation20_spill]] }
 0x1fa   : > { %s1415_s30 = sld [smem:[#allocation23_spill]]  ;;  %s1416_s21 = smov %s1056_s22 }
 0x1fb   : > { %s1417_s22 = smov %s1060_s23  ;;  %s1418_s23 = smov %s1259_s29 }
 0x1fc   : > { %s1419_s24 = smov %s1068_s25  ;;  %s1420_s25 = smov %s1072_s26 }
 0x1fd   : > { %s1421_s26 = smov %s1262_s6  ;;  %s1422_s29 = smov %s1424_s1 }
 0x1fe   :  { %22 = sbr.rel (!%p20_p3) target bundleno = 17 (0x11), region = 115 }
 0x203   :  { %579 = vsyncpa [#allocation8], 1 }
 0x204   :  { %581 = vsyncpa [#allocation8 + $0x1], 1 }
 0x205   :  { %582 = vsyncpa [#allocation11], 1 }
 0x206   :  { %583 = vsyncpa [#allocation9], 1 }
 0x207   :  { %585 = vsyncpa [#allocation9 + $0x1], 1 }

</bundles_post_ra>
